<compile_context>
chip_gen: v7x
topology: tpu7x:2x2x1
jax: 0.10.0
libtpu: 0.0.40
codegen_flags: <defaults>
</compile_context>

<pallas_src>
import functools
import math

import jax
import jax.numpy as jnp
from jax.experimental import pallas as pl
from jax.experimental.pallas import tpu as pltpu


# ----------------------------------------------------------------------------
# Kernel: per-(spatial-split, batch) partial sums for the Dice / F-score.
# Grid = (SPLIT, N, steps); logits blocked (1, C, TR, 128), labels blocked
# (1, 1, TR, 128); the three (1, 1, 1, C) outputs are written once, at the
# last spatial step of each (split, batch) pair.
# ----------------------------------------------------------------------------
def _fscore_sums_kernel(x_ref, t_ref, inter_ref, isum_ref, tsum_ref, acc_ref):
    s = pl.program_id(2)
    ns = pl.num_programs(2)

    @pl.when(s == 0)
    def _():
        acc_ref[...] = jnp.zeros_like(acc_ref)

    x = x_ref[0].astype(jnp.float32)            # (C, TR, 128)
    t = t_ref[0, 0].astype(jnp.int32)           # (TR, 128)
    C, TR = x.shape[0], x.shape[1]
    G = TR // 8                                 # f32 vreg groups along sublanes

    # numerically-stable softmax over the leading class axis: the max / sum
    # across C are elementwise VPU ops on full (TR, 128) vregs.
    m = jnp.max(x, axis=0, keepdims=True)
    e = jnp.exp(x - m)
    denom = jnp.sum(e, axis=0, keepdims=True)
    # exact reciprocal keeps the analytic padding correction (pad/C) exact
    p = e * pl.reciprocal(denom, approx=False)  # (C, TR, 128)

    # one-hot via a single iota compare, folded into I and T with selects
    cls = jax.lax.broadcasted_iota(jnp.int32, (C, TR, 128), 0)
    oh = t[None, :, :] == cls                   # bool (C, TR, 128)
    inter = jnp.where(oh, p, 0.0)
    ohf = jnp.where(oh, 1.0, 0.0)

    # per-step: fold only the vreg-group axis (full-vreg VALU adds); the
    # cross-sublane / cross-lane reduce runs once per (split, batch) below.
    acc_ref[0] += inter.reshape(C, G, 8, 128).sum(axis=1)   # intersection
    acc_ref[1] += p.reshape(C, G, 8, 128).sum(axis=1)       # prob sum
    acc_ref[2] += ohf.reshape(C, G, 8, 128).sum(axis=1)     # target count

    @pl.when(s == ns - 1)
    def _():
        part = jnp.sum(acc_ref[...], axis=2)    # (3, C, 128) fold sublanes
        totals = jnp.sum(part, axis=2)          # (3, C)      fold lanes
        inter_ref[...] = totals[0:1].reshape(1, 1, 1, C)
        isum_ref[...] = totals[1:2].reshape(1, 1, 1, C)
        tsum_ref[...] = totals[2:3].reshape(1, 1, 1, C)


@functools.lru_cache(maxsize=1)
def _hw_budgets():
    """Per-generation (block_budget, row_cap, base_vmem_limit, vmem_cap)."""
    cap = 64 << 20                                   # conservative (v7x) default
    try:
        cap = int(getattr(pltpu.get_tpu_info(), "vmem_capacity_bytes", cap))
    except Exception:
        pass
    if cap >= (100 << 20):                           # v5e / v6e: 128 MiB VMEM
        return (3 << 20), 512, (80 << 20), cap
    return (2 << 20), 512, (48 << 20), cap           # v7x: 64 MiB VMEM


def _pick_tiling(C, S, x_itemsize, block_budget, row_cap):
    """Rows-per-tile (multiple of the sublane tile of every streamed dtype)
    plus the target dtype and alignment. int8 targets cost 4x less label HBM
    traffic but force 32-row alignment; fall back to int32 targets when C is
    large enough that a 32-row logits block would blow the block budget."""
    align_x = {4: 8, 2: 16, 1: 32}.get(int(x_itemsize), 8)
    bytes_per_row = C * 128 * int(x_itemsize)
    if C <= 127 and 32 * bytes_per_row <= block_budget:
        align, tgt_dtype = max(32, align_x), jnp.int8
    else:
        align, tgt_dtype = max(8, align_x), jnp.int32
    tr = max(align, (block_budget // bytes_per_row // align) * align)
    tr = min(tr, max(align, (row_cap // align) * align))
    return tr, align, tgt_dtype


@jax.jit
def _fscore_sums(logits, target):
    """Returns (intersection, prob_sum, onehot_sum), each of shape (N, C)."""
    N, C = logits.shape[0], logits.shape[1]
    S = math.prod(logits.shape[2:])
    x = logits.reshape(N, C, S)                       # keep original dtype
    x_itemsize = jnp.dtype(x.dtype).itemsize

    block_budget, row_cap, base_limit, vmem_cap = _hw_budgets()
    tr, align, tgt_dtype = _pick_tiling(C, S, x_itemsize, block_budget, row_cap)
    t = target.reshape(N, S).astype(tgt_dtype)        # narrow label stream

    rows_needed = pl.cdiv(S, 128)
    # Single-sample inputs: split the spatial axis across 2 parallel grid
    # slots so both v7x TensorCores stay busy (harmless on 1-TC chips).
    split = 2 if (N == 1 and rows_needed >= 2 * align) else 1
    tr = min(tr, pl.cdiv(pl.cdiv(rows_needed, split), align) * align)

    chunk = tr * 128 * split
    s_pad = pl.cdiv(S, chunk) * chunk
    pad = s_pad - S
    if pad:
        x = jnp.pad(x, ((0, 0), (0, 0), (0, pad)))               # zero logits
        t = jnp.pad(t, ((0, 0), (0, pad)), constant_values=-1)   # no class
    rows = s_pad // 128
    steps = rows // (tr * split)
    x = x.reshape(N, C, rows, 128)                    # lane-dense spatial
    t = t.reshape(N, 1, rows, 128)

    # scoped-VMEM limit: per-generation base, bumped for big-C blocks
    f32_blk = C * tr * 128 * 4
    est = (4 * (C * tr * 128 * x_itemsize + tr * 128 * t.dtype.itemsize)
           + 6 * f32_blk + 3 * C * 8 * 128 * 4 + (1 << 20))
    vmem_limit = int(min(max(base_limit, est), vmem_cap - (12 << 20)))

    in_map = lambda p, n, s: (n, 0, p * steps + s, 0)
    out_shape = tuple(jax.ShapeDtypeStruct((split, N, 1, C), jnp.float32)
                      for _ in range(3))
    inter, isum, tsum = pl.pallas_call(
        _fscore_sums_kernel,
        out_shape=out_shape,
        grid_spec=pltpu.PrefetchScalarGridSpec(
            num_scalar_prefetch=0,
            grid=(split, N, steps),
            in_specs=[
                pl.BlockSpec((1, C, tr, 128), in_map),
                pl.BlockSpec((1, 1, tr, 128), in_map),
            ],
            out_specs=[pl.BlockSpec((1, 1, 1, C),
                                    lambda p, n, s: (p, n, 0, 0))] * 3,
            scratch_shapes=[pltpu.VMEM((3, C, 8, 128), jnp.float32)],
        ),
        compiler_params=pltpu.CompilerParams(
            dimension_semantics=("parallel", "parallel", "arbitrary"),
            vmem_limit_bytes=vmem_limit),
    )(x, t)

    inter = inter[:, :, 0, :].sum(axis=0)             # (N, C)
    isum = isum[:, :, 0, :].sum(axis=0)
    tsum = tsum[:, :, 0, :].sum(axis=0)
    if pad:
        # Padded pixels (all-zero logits) contribute exactly 1/C per class to
        # the probability sum and nothing to I or T (their label -1 never
        # matches any class); remove that contribution analytically.
        isum = isum - (float(pad) / float(C))
    return inter, isum, tsum


class Fscore:
    """JAX/Pallas re-implementation of the PyTorch Fscore module."""

    def __init__(self, smooth=1.0, beta=2, reduce='mean', detail=False):
        self.reduce = reduce
        self.smooth = float(smooth)
        self.detail = detail
        self.beta = float(beta ** 2)

    def __call__(self, input, target):
        N = target.shape[0]
        C = input.shape[1]
        inter, isum, tsum = _fscore_sums(input, target)
        dice = ((1.0 + self.beta) * inter + self.smooth) / (
            isum + self.beta * tsum + self.smooth)
        if self.detail:
            return C * 1.0 - dice.sum(axis=1)
        elif self.reduce == 'mean':
            return (C * 1.0 - dice.sum(axis=1)).mean()
        elif self.reduce == 'sum':
            return N - dice.sum()
        raise ValueError(f"unknown reduce={self.reduce!r}")


# ----------------------------------------------------------------------------
# Pure-JAX reference (same math as the PyTorch module) for correctness checks.
# ----------------------------------------------------------------------------
def _ref_fscore(logits, target, smooth=1.0, beta=2, reduce='mean', detail=False):
    N, C = logits.shape[0], logits.shape[1]
    beta2 = float(beta ** 2)
    x = logits.reshape(N, C, -1).astype(jnp.float32)
    t = target.reshape(N, -1)
    p = jax.nn.softmax(x, axis=1)
    onehot = jax.nn.one_hot(t, C, axis=1, dtype=jnp.float32)
    inter = jnp.sum(p * onehot, axis=2)
    dice = ((1.0 + beta2) * inter + smooth) / (
        jnp.sum(p, axis=2) + beta2 * jnp.sum(onehot, axis=2) + smooth)
    if detail:
        return C * 1.0 - dice.sum(axis=1)
    if reduce == 'mean':
        return (C * 1.0 - dice.sum(axis=1)).mean()
    return N - dice.sum()


if __name__ == "__main__":
    key = jax.random.PRNGKey(0)
    k = jax.random.split(key, 8)

    # Case 1: 4-class head, f32 logits, 'mean' reduction.
    x1 = jax.random.normal(k[0], (2, 4, 16, 16), jnp.float32)
    t1 = jax.random.randint(k[1], (2, 16, 16), 0, 4, jnp.int32)
    loss1 = jax.block_until_ready(Fscore(smooth=1.0, beta=2, reduce='mean')(x1, t1))
    ref1 = _ref_fscore(x1, t1, reduce='mean')
    assert jnp.allclose(loss1, ref1, rtol=1e-3, atol=1e-3), (loss1, ref1)

    # Case 2: binary head, bf16 logits, odd spatial size (exercises the
    #         padding + analytic P correction path), 'sum' reduction.
    x2 = jax.random.normal(k[2], (2, 2, 10, 13), jnp.bfloat16)
    t2 = jax.random.randint(k[3], (2, 10, 13), 0, 2, jnp.int32)
    loss2 = jax.block_until_ready(Fscore(smooth=1.0, beta=2, reduce='sum')(x2, t2))
    ref2 = _ref_fscore(x2, t2, reduce='sum')
    assert jnp.allclose(loss2, ref2, rtol=1e-3, atol=1e-3), (loss2, ref2)

    # Case 3: detail=True returns the per-sample vector.
    loss3 = jax.block_until_ready(Fscore(smooth=1.0, beta=2, detail=True)(x1, t1))
    ref3 = _ref_fscore(x1, t1, detail=True)
    assert jnp.allclose(loss3, ref3, rtol=1e-3, atol=1e-3), (loss3, ref3)

    # Case 4: single-sample input (exercises the 2-way spatial split for the
    #         v7x megacore path + padding correction), 3 classes, 'mean'.
    x4 = jax.random.normal(k[4], (1, 3, 96, 96), jnp.float32)
    t4 = jax.random.randint(k[5], (1, 96, 96), 0, 3, jnp.int32)
    loss4 = jax.block_until_ready(Fscore(smooth=1.0, beta=2, reduce='mean')(x4, t4))
    ref4 = _ref_fscore(x4, t4, reduce='mean')
    assert jnp.allclose(loss4, ref4, rtol=1e-3, atol=1e-3), (loss4, ref4)

    print("KERNEL_OK")
</pallas_src>

<mosaic_0001>
module attributes {stable_mosaic.version = 11 : i64} {
  func.func @_fscore_sums_kernel(%arg0: i32, %arg1: i32, %arg2: i32, %arg3: memref<1x4x32x128xf32, #tpu.memory_space<vmem>>, %arg4: memref<1x1x32x128xi8, #tpu.memory_space<vmem>>, %arg5: memref<1x1x1x4xf32, #tpu.memory_space<vmem>>, %arg6: memref<1x1x1x4xf32, #tpu.memory_space<vmem>>, %arg7: memref<1x1x1x4xf32, #tpu.memory_space<vmem>>, %arg8: memref<3x4x8x128xf32, #tpu.memory_space<vmem>>) attributes {dimension_semantics = [#tpu.dimension_semantics<parallel>, #tpu.dimension_semantics<parallel>, #tpu.dimension_semantics<arbitrary>], iteration_bounds = array<i64: 1, 2, 1>, scalar_prefetch = 0 : i64, scratch_operands = 1 : i64, tpu.core_type = #tpu.core_type<tc>, window_params = [{transform_indices = @transform_0, window_bounds = array<i64: 1, 4, 32, 128>}, {transform_indices = @transform_1, window_bounds = array<i64: 1, 1, 32, 128>}, {transform_indices = @transform_2, window_bounds = array<i64: 1, 1, 1, 4>}, {transform_indices = @transform_3, window_bounds = array<i64: 1, 1, 1, 4>}, {transform_indices = @transform_4, window_bounds = array<i64: 1, 1, 1, 4>}]} {
    %c0_i32 = arith.constant 0 : i32
    %0 = arith.cmpi eq, %arg2, %c0_i32 : i32
    %1 = arith.extui %0 : i1 to i32
    %c0_i32_0 = arith.constant 0 : i32
    %2 = arith.cmpi ne, %1, %c0_i32_0 : i32
    scf.if %2 {
      %cst_39 = arith.constant 0.000000e+00 : f32
      %54 = vector.broadcast %cst_39 : f32 to vector<3x4x8x128xf32>
      %c0_40 = arith.constant 0 : index
      %c0_41 = arith.constant 0 : index
      %c0_42 = arith.constant 0 : index
      %c0_43 = arith.constant 0 : index
      %55 = vector.load %arg8[%c0_40, %c0_41, %c0_42, %c0_43] : memref<3x4x8x128xf32, #tpu.memory_space<vmem>>, vector<3x4x8x128xf32>
      tpu.vector_store %arg8[%c0_40, %c0_41, %c0_42, %c0_43], %54 {strides = array<i32>} : memref<3x4x8x128xf32, #tpu.memory_space<vmem>>, vector<3x4x8x128xf32>,
    } else {
    }
    %c0 = arith.constant 0 : index
    %c0_1 = arith.constant 0 : index
    %c0_2 = arith.constant 0 : index
    %c0_3 = arith.constant 0 : index
    %3 = vector.load %arg3[%c0, %c0_1, %c0_2, %c0_3] : memref<1x4x32x128xf32, #tpu.memory_space<vmem>>, vector<1x4x32x128xf32>
    %4 = vector.shape_cast %3 : vector<1x4x32x128xf32> to vector<4x32x128xf32>
    %c0_4 = arith.constant 0 : index
    %c0_5 = arith.constant 0 : index
    %c0_6 = arith.constant 0 : index
    %c0_7 = arith.constant 0 : index
    %5 = vector.load %arg4[%c0_4, %c0_5, %c0_6, %c0_7] : memref<1x1x32x128xi8, #tpu.memory_space<vmem>>, vector<1x1x32x128xi8>
    %6 = vector.shape_cast %5 : vector<1x1x32x128xi8> to vector<32x128xi8>
    %7 = arith.extsi %6 : vector<32x128xi8> to vector<32x128xi32>
    %cst = arith.constant dense<0xFF800000> : vector<32x128xf32>
    %8 = vector.multi_reduction <maximumf>, %4, %cst [0] : vector<4x32x128xf32> to vector<32x128xf32>
    %9 = vector.shape_cast %8 : vector<32x128xf32> to vector<1x32x128xf32>
    %10 = vector.broadcast %9 : vector<1x32x128xf32> to vector<4x32x128xf32>
    %11 = arith.subf %4, %10 : vector<4x32x128xf32>
    %12 = math.exp %11 : vector<4x32x128xf32>
    %cst_8 = arith.constant dense<0.000000e+00> : vector<32x128xf32>
    %13 = vector.multi_reduction <add>, %12, %cst_8 [0] : vector<4x32x128xf32> to vector<32x128xf32>
    %14 = vector.shape_cast %13 : vector<32x128xf32> to vector<1x32x128xf32>
    %15 = tpu.reciprocal %14 : vector<1x32x128xf32> -> vector<1x32x128xf32>
    %16 = vector.broadcast %15 : vector<1x32x128xf32> to vector<4x32x128xf32>
    %17 = arith.mulf %12, %16 : vector<4x32x128xf32>
    %18 = tpu.iota {dimensions = array<i32: 0>} : vector<4x32x128xi32>
    %19 = vector.shape_cast %7 : vector<32x128xi32> to vector<1x32x128xi32>
    %20 = vector.broadcast %19 : vector<1x32x128xi32> to vector<4x32x128xi32>
    %21 = arith.cmpi eq, %20, %18 : vector<4x32x128xi32>
    %cst_9 = arith.constant 0.000000e+00 : f32
    %22 = vector.broadcast %cst_9 : f32 to vector<4x32x128xf32>
    %23 = arith.select %21, %17, %22 : vector<4x32x128xi1>, vector<4x32x128xf32>
    %cst_10 = arith.constant 1.000000e+00 : f32
    %cst_11 = arith.constant 0.000000e+00 : f32
    %24 = vector.broadcast %cst_10 : f32 to vector<4x32x128xf32>
    %25 = vector.broadcast %cst_11 : f32 to vector<4x32x128xf32>
    %26 = arith.select %21, %24, %25 : vector<4x32x128xi1>, vector<4x32x128xf32>
    %c0_12 = arith.constant 0 : index
    %c0_13 = arith.constant 0 : index
    %c0_14 = arith.constant 0 : index
    %c0_15 = arith.constant 0 : index
    %27 = vector.load %arg8[%c0_12, %c0_13, %c0_14, %c0_15] : memref<3x4x8x128xf32, #tpu.memory_space<vmem>>, vector<1x4x8x128xf32>
    %28 = vector.shape_cast %27 : vector<1x4x8x128xf32> to vector<4x8x128xf32>
    %29 = vector.shape_cast %23 : vector<4x32x128xf32> to vector<4x4x8x128xf32>
    %cst_16 = arith.constant dense<0.000000e+00> : vector<4x8x128xf32>
    %30 = vector.multi_reduction <add>, %29, %cst_16 [1] : vector<4x4x8x128xf32> to vector<4x8x128xf32>
    %31 = arith.addf %28, %30 : vector<4x8x128xf32>
    %c0_17 = arith.constant 0 : index
    %c0_18 = arith.constant 0 : index
    %c0_19 = arith.constant 0 : index
    %c0_20 = arith.constant 0 : index
    %32 = vector.load %arg8[%c0_17, %c0_18, %c0_19, %c0_20] : memref<3x4x8x128xf32, #tpu.memory_space<vmem>>, vector<1x4x8x128xf32>
    %33 = vector.shape_cast %32 : vector<1x4x8x128xf32> to vector<4x8x128xf32>
    %34 = vector.shape_cast %31 : vector<4x8x128xf32> to vector<1x4x8x128xf32>
    tpu.vector_store %arg8[%c0_17, %c0_18, %c0_19, %c0_20], %34 {strides = array<i32>} : memref<3x4x8x128xf32, #tpu.memory_space<vmem>>, vector<1x4x8x128xf32>,
    %c1 = arith.constant 1 : index
    %c0_21 = arith.constant 0 : index
    %c0_22 = arith.constant 0 : index
    %c0_23 = arith.constant 0 : index
    %35 = vector.load %arg8[%c1, %c0_21, %c0_22, %c0_23] : memref<3x4x8x128xf32, #tpu.memory_space<vmem>>, vector<1x4x8x128xf32>
    %36 = vector.shape_cast %35 : vector<1x4x8x128xf32> to vector<4x8x128xf32>
    %37 = vector.shape_cast %17 : vector<4x32x128xf32> to vector<4x4x8x128xf32>
    %cst_24 = arith.constant dense<0.000000e+00> : vector<4x8x128xf32>
    %38 = vector.multi_reduction <add>, %37, %cst_24 [1] : vector<4x4x8x128xf32> to vector<4x8x128xf32>
    %39 = arith.addf %36, %38 : vector<4x8x128xf32>
    %c1_25 = arith.constant 1 : index
    %c0_26 = arith.constant 0 : index
    %c0_27 = arith.constant 0 : index
    %c0_28 = arith.constant 0 : index
    %40 = vector.load %arg8[%c1_25, %c0_26, %c0_27, %c0_28] : memref<3x4x8x128xf32, #tpu.memory_space<vmem>>, vector<1x4x8x128xf32>
    %41 = vector.shape_cast %40 : vector<1x4x8x128xf32> to vector<4x8x128xf32>
    %42 = vector.shape_cast %39 : vector<4x8x128xf32> to vector<1x4x8x128xf32>
    tpu.vector_store %arg8[%c1_25, %c0_26, %c0_27, %c0_28], %42 {strides = array<i32>} : memref<3x4x8x128xf32, #tpu.memory_space<vmem>>, vector<1x4x8x128xf32>,
    %c2 = arith.constant 2 : index
    %c0_29 = arith.constant 0 : index
    %c0_30 = arith.constant 0 : index
    %c0_31 = arith.constant 0 : index
    %43 = vector.load %arg8[%c2, %c0_29, %c0_30, %c0_31] : memref<3x4x8x128xf32, #tpu.memory_space<vmem>>, vector<1x4x8x128xf32>
    %44 = vector.shape_cast %43 : vector<1x4x8x128xf32> to vector<4x8x128xf32>
    %45 = vector.shape_cast %26 : vector<4x32x128xf32> to vector<4x4x8x128xf32>
    %cst_32 = arith.constant dense<0.000000e+00> : vector<4x8x128xf32>
    %46 = vector.multi_reduction <add>, %45, %cst_32 [1] : vector<4x4x8x128xf32> to vector<4x8x128xf32>
    %47 = arith.addf %44, %46 : vector<4x8x128xf32>
    %c2_33 = arith.constant 2 : index
    %c0_34 = arith.constant 0 : index
    %c0_35 = arith.constant 0 : index
    %c0_36 = arith.constant 0 : index
    %48 = vector.load %arg8[%c2_33, %c0_34, %c0_35, %c0_36] : memref<3x4x8x128xf32, #tpu.memory_space<vmem>>, vector<1x4x8x128xf32>
    %49 = vector.shape_cast %48 : vector<1x4x8x128xf32> to vector<4x8x128xf32>
    %50 = vector.shape_cast %47 : vector<4x8x128xf32> to vector<1x4x8x128xf32>
    tpu.vector_store %arg8[%c2_33, %c0_34, %c0_35, %c0_36], %50 {strides = array<i32>} : memref<3x4x8x128xf32, #tpu.memory_space<vmem>>, vector<1x4x8x128xf32>,
    %c0_i32_37 = arith.constant 0 : i32
    %51 = arith.cmpi eq, %arg2, %c0_i32_37 : i32
    %52 = arith.extui %51 : i1 to i32
    %c0_i32_38 = arith.constant 0 : i32
    %53 = arith.cmpi ne, %52, %c0_i32_38 : i32
    scf.if %53 {
      %c0_39 = arith.constant 0 : index
      %c0_40 = arith.constant 0 : index
      %c0_41 = arith.constant 0 : index
      %c0_42 = arith.constant 0 : index
      %54 = vector.load %arg8[%c0_39, %c0_40, %c0_41, %c0_42] : memref<3x4x8x128xf32, #tpu.memory_space<vmem>>, vector<3x4x8x128xf32>
      %cst_43 = arith.constant dense<0.000000e+00> : vector<3x4x128xf32>
      %55 = vector.multi_reduction <add>, %54, %cst_43 [2] : vector<3x4x8x128xf32> to vector<3x4x128xf32>
      %cst_44 = arith.constant dense<0.000000e+00> : vector<3x4xf32>
      %56 = vector.multi_reduction <add>, %55, %cst_44 [2] : vector<3x4x128xf32> to vector<3x4xf32>
      %57 = vector.extract_strided_slice %56 {offsets = [0, 0], sizes = [1, 4], strides = [1, 1]} : vector<3x4xf32> to vector<1x4xf32>
      %58 = vector.shape_cast %57 : vector<1x4xf32> to vector<1x1x1x4xf32>
      %c0_45 = arith.constant 0 : index
      %c0_46 = arith.constant 0 : index
      %c0_47 = arith.constant 0 : index
      %c0_48 = arith.constant 0 : index
      %59 = vector.load %arg5[%c0_45, %c0_46, %c0_47, %c0_48] : memref<1x1x1x4xf32, #tpu.memory_space<vmem>>, vector<1x1x1x4xf32>
      tpu.vector_store %arg5[%c0_45, %c0_46, %c0_47, %c0_48], %58 {strides = array<i32>} : memref<1x1x1x4xf32, #tpu.memory_space<vmem>>, vector<1x1x1x4xf32>,
      %60 = vector.extract_strided_slice %56 {offsets = [1, 0], sizes = [1, 4], strides = [1, 1]} : vector<3x4xf32> to vector<1x4xf32>
      %61 = vector.shape_cast %60 : vector<1x4xf32> to vector<1x1x1x4xf32>
      %c0_49 = arith.constant 0 : index
      %c0_50 = arith.constant 0 : index
      %c0_51 = arith.constant 0 : index
      %c0_52 = arith.constant 0 : index
      %62 = vector.load %arg6[%c0_49, %c0_50, %c0_51, %c0_52] : memref<1x1x1x4xf32, #tpu.memory_space<vmem>>, vector<1x1x1x4xf32>
      tpu.vector_store %arg6[%c0_49, %c0_50, %c0_51, %c0_52], %61 {strides = array<i32>} : memref<1x1x1x4xf32, #tpu.memory_space<vmem>>, vector<1x1x1x4xf32>,
      %63 = vector.extract_strided_slice %56 {offsets = [2, 0], sizes = [1, 4], strides = [1, 1]} : vector<3x4xf32> to vector<1x4xf32>
      %64 = vector.shape_cast %63 : vector<1x4xf32> to vector<1x1x1x4xf32>
      %c0_53 = arith.constant 0 : index
      %c0_54 = arith.constant 0 : index
      %c0_55 = arith.constant 0 : index
      %c0_56 = arith.constant 0 : index
      %65 = vector.load %arg7[%c0_53, %c0_54, %c0_55, %c0_56] : memref<1x1x1x4xf32, #tpu.memory_space<vmem>>, vector<1x1x1x4xf32>
      tpu.vector_store %arg7[%c0_53, %c0_54, %c0_55, %c0_56], %64 {strides = array<i32>} : memref<1x1x1x4xf32, #tpu.memory_space<vmem>>, vector<1x1x1x4xf32>,
    } else {
    }
    return
  }
  func.func @transform_0(%arg0: i32, %arg1: i32, %arg2: i32) -> (i32, i32, i32, i32) {
    %c1_i32 = arith.constant 1 : i32
    %0 = arith.muli %arg0, %c1_i32 : i32
    %1 = arith.addi %0, %arg2 : i32
    %c0_i32 = arith.constant 0 : i32
    %c0_i32_0 = arith.constant 0 : i32
    %c0_i32_1 = arith.constant 0 : i32
    return %arg1, %c0_i32, %1, %c0_i32_0 : i32, i32, i32, i32
  }
  func.func @transform_1(%arg0: i32, %arg1: i32, %arg2: i32) -> (i32, i32, i32, i32) {
    %c1_i32 = arith.constant 1 : i32
    %0 = arith.muli %arg0, %c1_i32 : i32
    %1 = arith.addi %0, %arg2 : i32
    %c0_i32 = arith.constant 0 : i32
    %c0_i32_0 = arith.constant 0 : i32
    %c0_i32_1 = arith.constant 0 : i32
    return %arg1, %c0_i32, %1, %c0_i32_0 : i32, i32, i32, i32
  }
  func.func @transform_2(%arg0: i32, %arg1: i32, %arg2: i32) -> (i32, i32, i32, i32) {
    %c0_i32 = arith.constant 0 : i32
    %c0_i32_0 = arith.constant 0 : i32
    %c0_i32_1 = arith.constant 0 : i32
    return %arg0, %arg1, %c0_i32, %c0_i32_0 : i32, i32, i32, i32
  }
  func.func @transform_3(%arg0: i32, %arg1: i32, %arg2: i32) -> (i32, i32, i32, i32) {
    %c0_i32 = arith.constant 0 : i32
    %c0_i32_0 = arith.constant 0 : i32
    %c0_i32_1 = arith.constant 0 : i32
    return %arg0, %arg1, %c0_i32, %c0_i32_0 : i32, i32, i32, i32
  }
  func.func @transform_4(%arg0: i32, %arg1: i32, %arg2: i32) -> (i32, i32, i32, i32) {
    %c0_i32 = arith.constant 0 : i32
    %c0_i32_0 = arith.constant 0 : i32
    %c0_i32_1 = arith.constant 0 : i32
    return %arg0, %arg1, %c0_i32, %c0_i32_0 : i32, i32, i32, i32
  }
}

</mosaic_0001>

<bundles_post_ra>
// kernel: _fscore_sums.1
= control target key start
LH: loop header
LB: loop body
LE: loop exit
PB: predicated region body
PF: predicated region fallthrough
CT: control target
= control target key end

     0   :  { %10 = vsyncpa [#allocation4], 0  ;;  %s1457_s0 = inlined_call_operand.vmem [shape: f32[2,4,32,128], index: 0, kind: input, shape index: {}]   ;;  %s1458_s1 = inlined_call_operand.vmem [shape: s8[2,1,32,128], index: 1, kind: input, shape index: {}]   ;;  %s1459_s2 = inlined_call_operand.hbm [shape: f32[1,2,1,4], index: 2, kind: output, shape index: {0}]   ;;  %s1460_s3 = inlined_call_operand.vmem [shape: f32[1,2,1,4], index: 3, kind: output, shape index: {1}]   ;;  %s1461_s4 = inlined_call_operand.hbm [shape: f32[1,2,1,4], index: 4, kind: output, shape index: {2}]  }
   0x1   :  { %12 = vsyncpa [#allocation4 + $0x1], 0 }
   0x2   :  { %13 = vsyncpa [#allocation6], 0 }
   0x3   :  { %15 = vsyncpa [#allocation6 + $0x1], 0  ;;  %s1151_s15 = smov 0   ;;  %s1153_s16 = smov 0  }
   0x4   :  { %s1155_s17 = smov 0   ;;  %s1157_s18 = smov 0  }
   0x5   :  { %s1159_s19 = smov 0   ;;  %s1161_s20 = smov 0  }
   0x6 LB: > { %s897_s21 = sadd.s32 4294967295, %s1121_s20   ;;  %s898_s22 = sadd.s32 4294967294, %s1121_s20   ;;  %s1121_s20 = sphi %s1161_s20, %s21_s20   ;;  %s1117_s19 = sphi %s1159_s19, %s1472_s19   ;;  %s1113_s18 = sphi %s1157_s18, %s1471_s18   ;;  %s1109_s17 = sphi %s1155_s17, %s1470_s17   ;;  %s1105_s16 = sphi %s1153_s16, %s1469_s16   ;;  %s1101_s15 = sphi %s1151_s15, %s1468_s15  }
   0x7   : > { %s36_s23 = sadd.s32 1, %s1117_s19  ;;  %s109_s24 = sadd.s32 1, %s1109_s17 }
   0x8   : > { %p38_p0 = scmp.ge.s32.totalorder %s36_s23, 2  ;;  %p119_p1 = scmp.ne.s32.totalorder %s1109_s17, %s1105_s16 }
   0x9   : > { %p120_p2 = scmp.eq.s32.totalorder %s897_s21, 1  ;;  %p125_p3 = scmp.ne.s32.totalorder %s1105_s16, %s1101_s15 }
   0xa   : > { %s1474_s23 = smov (%p38_p0, %s36_s23), 0  ;;  %p126_p5 = scmp.eq.s32.totalorder %s898_s22, 1 }
   0xb   : > { %p1191_p4 = por %p120_p2, %p119_p1  ;;  %s105_s26 = ssub.s32 %s1117_s19, %s1474_s23 }
   0xc   : > { %p901_p6 = scmp.ge.s32.totalorder %s1121_s20, 1  ;;  %p107_p7 = scmp.eq.s32.totalorder %s105_s26, 0 }
   0xd   : > { %p1198_p8 = por %p126_p5, %p125_p3  ;;  %p227_p9 = scmp.lt.s32.totalorder %s1121_s20, 3 }
   0xe   : > { %s1204_s28 = scalar_select %p107_p7, %s1109_s17, %s109_s24  }
   0xf   : > { %p228_p10 = pnand %p901_p6, %p227_p9 }
  0x10   : > { %p278_p11 = scmp.lt.s32.totalorder (!%p228_p10), %s1113_s18, 1  ;;  %s1354_s12 = sand.u32 (!%p228_p10), 1, %s1105_s16  }
  0x11   : > { %231 = sbr.rel (%p228_p10) target bundleno = 291 (0x123), region = 28  ;;  %s905_s13 = sshll.u32 (!%p228_p10), %s1113_s18, 4 }
  0x12   : > { %s260_s14 = scalar_lea.vmem (!%p228_p10), [#allocation3], %s1354_s12  ;;  %s1367_s6 = scalar_lea.hbm (!%p228_p10), %s1459_s2, %s905_s13 }
  0x13   : > { %s729_s21 = sshll.u32 (!%p228_p10), %s260_s14, 4  ;;  %s1124_s10 = smov (!%p228_p10), [#allocation3]   ;;  %s1369_s21 = int_to_ptr.vmem [resolvable:$true] %s729_s21 }
  0x14   : > { %s1011_s9 = scalar_lea.vmem (!%p228_p10), %s1369_s21, 16 }
  0x15   : > { %p1012_p12 = scmp.ne.s32.totalorder (!%p228_p10), %s1369_s21, %s1011_s9 }
  0x17   : > { %p1013_p13 = pnand (!%p228_p10), %p1012_p12, %p1191_p4 }
  0x18   : > { %s1208_s29 = scalar_select %p278_p11, %s1113_s18, 1 }
  0x19   : > { %p1014_p0 = pneg %p1013_p13 }
  0x1a   : > { %s909_s30 = sshll.u32 %s1208_s29, 7  ;;  %s904_s8 = sshll.u32 %s1208_s29, 3 }
  0x1b   : > { %s285_s7 = scalar_lea.vmem %s1457_s0, %s909_s30  ;;  %s295_s11 = scalar_lea.vmem %s1458_s1, %s904_s8 }
  0x1c   : > { %v320_v0 = vld [vmem:[%s285_s7] sm:$0xff]  ;;  %v321_v1 = vld [vmem:[%s285_s7 + $0x8] sm:$0xff]  ;;  %v322_v2 = vld [vmem:[%s285_s7 + $0x10] sm:$0xff]  ;;  %s303_s26 = scalar_lea.vmem %s1460_s3, %s1208_s29  ;;  %s704_s29 = scalar_lea.sflag [#allocation4], %s1354_s12 }
  0x1d   : > { %v323_v3 = vld [vmem:[%s285_s7 + $0x18] sm:$0xff]  ;;  %v324_v4 = vld [vmem:[%s285_s7 + $0x20] sm:$0xff]  ;;  %v325_v5 = vld [vmem:[%s285_s7 + $0x28] sm:$0xff] }
  0x1e   : > { %v326_v6 = vld [vmem:[%s285_s7 + $0x30] sm:$0xff]  ;;  %v327_v7 = vld [vmem:[%s285_s7 + $0x38] sm:$0xff]  ;;  %v328_v8 = vld [vmem:[%s285_s7 + $0x40] sm:$0xff]  ;;  %v341_v9 = vmax.f32 %v320_v0, %v324_v4  ;;  %v344_v10 = vmax.f32 %v321_v1, %v325_v5 }
  0x1f   : > { %v329_v11 = vld [vmem:[%s285_s7 + $0x48] sm:$0xff]  ;;  %v330_v12 = vld [vmem:[%s285_s7 + $0x50] sm:$0xff]  ;;  %v331_v13 = vld [vmem:[%s285_s7 + $0x58] sm:$0xff]  ;;  %v347_v14 = vmax.f32 %v322_v2, %v326_v6  ;;  %v350_v15 = vmax.f32 %v323_v3, %v327_v7 }
  0x20   : > { %v332_v16 = vld [vmem:[%s285_s7 + $0x60] sm:$0xff]  ;;  %v333_v17 = vld [vmem:[%s285_s7 + $0x68] sm:$0xff]  ;;  %v334_v18 = vld [vmem:[%s285_s7 + $0x70] sm:$0xff]  ;;  %v342_v19 = vmax.f32 %v341_v9, %v328_v8  ;;  %v345_v20 = vmax.f32 %v344_v10, %v329_v11 }
  0x21   : > { %v335_v21 = vld [vmem:[%s285_s7 + $0x78] sm:$0xff]  ;;  %v348_v22 = vmax.f32 %v347_v14, %v330_v12  ;;  %v351_v23 = vmax.f32 %v350_v15, %v331_v13  ;;  %v336_v24 = vld [vmem:[%s295_s11] sm:$0xff]  ;;  %s275_s7 = scalar_lea.vmem [#allocation5], %s1354_s12  ;;  %s1015_s11 = sshll.u32 %s1124_s10, 4  ;;  %s1016_s11 = int_to_ptr.vmem [resolvable:$false] %s1015_s11 }
  0x22   : > { %v343_v25 = vmax.f32 %v342_v19, %v332_v16  ;;  %v346_v26 = vmax.f32 %v345_v20, %v333_v17  ;;  %v1218_v29 = vunpack.c.0.s8 %v336_v24  ;;  %v1220_v33 = vunpack.c.1.s8 %v336_v24  ;;  %s1374_s8 = sshll.u32 %s275_s7, 4  ;;  %s1017_s22 = scalar_lea.vmem %s1016_s11, 32  ;;  %s1408_s8 = int_to_ptr.vmem [resolvable:$true] %s1374_s8 }
  0x23   : > { %v349_v27 = vmax.f32 %v348_v22, %v334_v18  ;;  %v352_v28 = vmax.f32 %v351_v23, %v335_v21  ;;  %v1222_v34 = vunpack.c.2.s8 %v336_v24  ;;  %v1224_v35 = vunpack.c.3.s8 %v336_v24  ;;  %p1018_p1 = scmp.lt.s32.totalorder %s1369_s21, %s1016_s11  ;;  %p1019_p2 = scmp.lt.s32.totalorder %s1017_s22, %s1011_s9 }
  0x24   : > { %v353_v30 = vsub.f32 %v320_v0, %v343_v25  ;;  %v354_v31 = vsub.f32 %v321_v1, %v346_v26  ;;  %v357_v37 = vsub.f32 %v324_v4, %v343_v25  ;;  %v358_v38 = vsub.f32 %v325_v5, %v346_v26 }
  0x25   : > { %v355_v32 = vsub.f32 %v322_v2, %v349_v27  ;;  %v356_v36 = vsub.f32 %v323_v3, %v352_v28  ;;  %v359_v39 = vsub.f32 %v326_v6, %v349_v27  ;;  %v360_v40 = vsub.f32 %v327_v7, %v352_v28  ;;  %p1020_p3 = por %p1019_p2, %p1018_p1 }
  0x26   : > { %v361_v41 = vsub.f32 %v328_v8, %v343_v25  ;;  %v362_v42 = vsub.f32 %v329_v11, %v346_v26  ;;  %v363_v43 = vsub.f32 %v330_v12, %v349_v27  ;;  %v364_v44 = vsub.f32 %v331_v13, %v352_v28 }
  0x27   : > { %v365_v45 = vsub.f32 %v332_v16, %v343_v25  ;;  %v369_v46 = vmul.f32 1.442695, %v353_v30  ;;  %v371_v47 = vmul.f32 1.442695, %v354_v31  ;;  %v373_v48 = vmul.f32 1.442695, %v355_v32  ;;  %p1021_p5 = pnand %p1020_p3, %p1014_p0 }
  0x28   : > { %v366_v49 = vsub.f32 %v333_v17, %v346_v26  ;;  %v367_v50 = vsub.f32 %v334_v18, %v349_v27  ;;  %v368_v51 = vsub.f32 %v335_v21, %v352_v28  ;;  %v375_v52 = vmul.f32 1.442695, %v356_v36 }
  0x29   : > { %vm433_vm0 = vcmp.eq.s32.totalorder %v1218_v29, 0  ;;  %vm434_vm1 = vcmp.eq.s32.totalorder %v1220_v33, 0  ;;  %vm435_vm2 = vcmp.eq.s32.totalorder %v1222_v34, 0  ;;  %971 = vpow2.f32 %v369_v46 }
  0x2a   : > { %v377_v53 = vmul.f32 1.442695, %v357_v37  ;;  %v379_v54 = vmul.f32 1.442695, %v358_v38  ;;  %v381_v55 = vmul.f32 1.442695, %v359_v39  ;;  %973 = vpow2.f32 %v371_v47 }
  0x2b   : > { %vm436_vm3 = vcmp.eq.s32.totalorder %v1224_v35, 0  ;;  %v383_v56 = vmul.f32 1.442695, %v360_v40  ;;  %v385_v57 = vmul.f32 1.442695, %v361_v41  ;;  %975 = vpow2.f32 %v373_v48 }
  0x2c   : > { %v387_v58 = vmul.f32 1.442695, %v362_v42  ;;  %v389_v59 = vmul.f32 1.442695, %v363_v43  ;;  %v391_v60 = vmul.f32 1.442695, %v364_v44  ;;  %977 = vpow2.f32 %v375_v52 }
  0x2d   : > { %v393_v61 = vmul.f32 1.442695, %v365_v45  ;;  %v395_v62 = vmul.f32 1.442695, %v366_v49  ;;  %v397_v63 = vmul.f32 1.442695, %v367_v50  ;;  %979 = vpow2.f32 %v377_v53 }
  0x2e   : > { %v399_v0 = vmul.f32 1.442695, %v368_v51  ;;  %vm437_vm4 = vcmp.eq.s32.totalorder %v1218_v29, 1  ;;  %vm438_vm5 = vcmp.eq.s32.totalorder %v1220_v33, 1  ;;  %vm439_vm6 = vcmp.eq.s32.totalorder %v1222_v34, 1 }
  0x2f   : > { %981 = vpow2.f32 %v379_v54  ;;  %vm440_vm7 = vcmp.eq.s32.totalorder %v1224_v35, 1  ;;  %vm441_vm8 = vcmp.eq.s32.totalorder %v1218_v29, 2  ;;  %vm442_vm9 = vcmp.eq.s32.totalorder %v1220_v33, 2 }
  0x30   : > { %983 = vpow2.f32 %v381_v55  ;;  %vm443_vm10 = vcmp.eq.s32.totalorder %v1222_v34, 2  ;;  %vm444_vm11 = vcmp.eq.s32.totalorder %v1224_v35, 2  ;;  %vm445_vm12 = vcmp.eq.s32.totalorder %v1218_v29, 3 }
  0x31   : > { %985 = vpow2.f32 %v383_v56  ;;  %vm446_vm13 = vcmp.eq.s32.totalorder %v1220_v33, 3  ;;  %vm1463_vm14 = vcmp.eq.s32.totalorder %v1222_v34, 3  ;;  %vm1462_vm15 = vcmp.eq.s32.totalorder %v1224_v35, 3 }
  0x32   : > { %987 = vpow2.f32 %v385_v57  ;;  %v1123_v1 = vmov 0.0  }
  0x33   : > { %v465_v2 = vsel %vm433_vm0, 1.0, %v1123_v1  ;;  %v466_v3 = vsel %vm434_vm1, 1.0, %v1123_v1  ;;  %v467_v4 = vsel %vm435_vm2, 1.0, %v1123_v1  ;;  %989 = vpow2.f32 %v387_v58  ;;  %v1254_v8 = vpop.eup %971 }
  0x34   : > { %v468_v5 = vsel %vm436_vm3, 1.0, %v1123_v1  ;;  %v469_v6 = vsel %vm437_vm4, 1.0, %v1123_v1  ;;  %v470_v7 = vsel %vm438_vm5, 1.0, %v1123_v1  ;;  %991 = vpow2.f32 %v389_v59  ;;  %v1262_v12 = vpop.eup %973 }
  0x35   : > { %v471_v9 = vsel %vm439_vm6, 1.0, %v1123_v1  ;;  %v473_v10 = vsel %vm441_vm8, 1.0, %v1123_v1  ;;  %v474_v11 = vsel %vm442_vm9, 1.0, %v1123_v1  ;;  %993 = vpow2.f32 %v391_v60  ;;  %v1270_v16 = vpop.eup %975 }
  0x36   : > { %v472_v13 = vsel %vm440_vm7, 1.0, %v1123_v1  ;;  %v477_v14 = vsel %vm445_vm12, 1.0, %v1123_v1  ;;  %v478_v15 = vsel %vm446_vm13, 1.0, %v1123_v1  ;;  %995 = vpow2.f32 %v393_v61  ;;  %v1276_v20 = vpop.eup %977 }
  0x37   : > { %v475_v17 = vsel %vm443_vm10, 1.0, %v1123_v1  ;;  %v479_v18 = vsel %vm1463_vm14, 1.0, %v1123_v1  ;;  %v535_v19 = vadd.f32 %v466_v3, %v465_v2  ;;  %997 = vpow2.f32 %v395_v62  ;;  %v1278_v24 = vpop.eup %979 }
  0x38   : > { %v538_v21 = vadd.f32 %v470_v7, %v469_v6  ;;  %v541_v22 = vadd.f32 %v474_v11, %v473_v10  ;;  %v544_v23 = vadd.f32 %v478_v15, %v477_v14  ;;  %999 = vpow2.f32 %v397_v63 }
  0x39   : > { %v476_v25 = vsel %vm444_vm11, 1.0, %v1123_v1  ;;  %v480_v26 = vsel %vm1462_vm15, 1.0, %v1123_v1  ;;  %v536_v27 = vadd.f32 %v535_v19, %v467_v4  ;;  %v1284_v28 = vpop.eup %981  ;;  %1001 = vpow2.f32 %v399_v0 }
  0x3a   : > { %v401_v30 = vadd.f32 %v1278_v24, %v1254_v8  ;;  %v539_v31 = vadd.f32 %v538_v21, %v471_v9  ;;  %v542_v32 = vadd.f32 %v541_v22, %v475_v17  ;;  %v1288_v36 = vpop.eup %983  ;;  %v404_v37 = vadd.f32 %v1284_v28, %v1262_v12 }
  0x3b   : > { %v537_v38 = vadd.f32 %v536_v27, %v468_v5  ;;  %v545_v39 = vadd.f32 %v544_v23, %v479_v18  ;;  %v1292_v40 = vpop.eup %985  ;;  %v407_v41 = vadd.f32 %v1288_v36, %v1270_v16  ;;  %vm654_vm15 = vcmask 1041409  }
  0x3c   : > { %v540_v42 = vadd.f32 %v539_v31, %v472_v13  ;;  %v543_v43 = vadd.f32 %v542_v32, %v476_v25  ;;  %v988_v44 = vpop.eup %987  ;;  %v410_v45 = vadd.f32 %v1292_v40, %v1276_v20  ;;  %vm656_vm14 = vcmask 1042434  }
  0x3d   : > { %v546_v46 = vadd.f32 %v545_v39, %v480_v26  ;;  %v618_v47 = vrot.slane %v537_v38, 4  ;;  %v990_v48 = vpop.eup %989  ;;  %v402_v49 = vadd.f32 %v988_v44, %v401_v30 }
  0x3e   : > { %v624_v50 = vrot.slane %v540_v42, 4  ;;  %v630_v51 = vrot.slane %v543_v43, 4  ;;  %v992_v52 = vpop.eup %991  ;;  %v405_v53 = vadd.f32 %v990_v48, %v404_v37 }
  0x3f   : > { %v619_v54 = vadd.f32 %v618_v47, %v537_v38  ;;  %v636_v55 = vrot.slane %v546_v46, 4  ;;  %v994_v56 = vpop.eup %993  ;;  %v408_v57 = vadd.f32 %v992_v52, %v407_v41 }
  0x40   : > { %v625_v58 = vadd.f32 %v624_v50, %v540_v42  ;;  %v631_v59 = vadd.f32 %v630_v51, %v543_v43  ;;  %v996_v60 = vpop.eup %995  ;;  %v411_v61 = vadd.f32 %v994_v56, %v410_v45 }
  0x41   : > { %v620_v62 = vrot.slane %v619_v54, 2  ;;  %v637_v63 = vadd.f32 %v636_v55, %v546_v46  ;;  %v998_v0 = vpop.eup %997  ;;  %v403_v1 = vadd.f32 %v996_v60, %v402_v49 }
  0x42   : > { %v626_v2 = vrot.slane %v625_v58, 2  ;;  %v632_v3 = vrot.slane %v631_v59, 2  ;;  %v1000_v4 = vpop.eup %999  ;;  %v406_v5 = vadd.f32 %v998_v0, %v405_v53 }
  0x43   : > { %v621_v6 = vadd.f32 %v620_v62, %v619_v54  ;;  %v638_v7 = vrot.slane %v637_v63, 2  ;;  %v1002_v9 = vpop.eup %1001  ;;  %v409_v10 = vadd.f32 %v1000_v4, %v408_v57  ;;  %1003 = vrcp.f32 %v403_v1 }
  0x44   : > { %v627_v11 = vadd.f32 %v626_v2, %v625_v58  ;;  %v633_v13 = vadd.f32 %v632_v3, %v631_v59  ;;  %v412_v14 = vadd.f32 %v1002_v9, %v411_v61  ;;  %1005 = vrcp.f32 %v406_v5 }
  0x45   : > { %v622_v15 = vrot.slane %v621_v6, 1  ;;  %1007 = vrcp.f32 %v409_v10  ;;  %v639_v19 = vadd.f32 %v638_v7, %v637_v63 }
  0x46   : > { %v628_v17 = vrot.slane %v627_v11, 1  ;;  %v634_v18 = vrot.slane %v633_v13, 1  ;;  %1009 = vrcp.f32 %v412_v14 }
  0x47   : > { %v623_v21 = vadd.f32 %v622_v15, %v621_v6  ;;  %v640_v25 = vrot.slane %v639_v19, 1 }
  0x48   : > { %v629_v22 = vadd.f32 %v628_v17, %v627_v11  ;;  %v635_v23 = vadd.f32 %v634_v18, %v633_v13 }
  0x49   : > { %v1299_v30 = vadd.f32 %v640_v25, %v639_v19 }
  0x4a   : > { %v663_v26 = vsel %vm654_vm15, %v629_v22, %v623_v21 }
  0x4b   : > { %v1302_v31 = vsel %vm656_vm14, %v635_v23, %v663_v26 }
  0x4d   : > { %v1004_v27 = vpop.eup %1003 }
  0x4e   : > { %v1006_v32 = vpop.eup %1005  ;;  %v417_v37 = vmul.f32 %v1004_v27, %v1254_v8  ;;  %v421_v38 = vmul.f32 %v1004_v27, %v1278_v24  ;;  %v425_v39 = vmul.f32 %v1004_v27, %v988_v44  ;;  %v429_v41 = vmul.f32 %v1004_v27, %v996_v60 }
  0x4f   : > { %v1008_v42 = vpop.eup %1007  ;;  %v418_v43 = vmul.f32 %v1006_v32, %v1262_v12  ;;  %v422_v45 = vmul.f32 %v1006_v32, %v1284_v28  ;;  %v426_v46 = vmul.f32 %v1006_v32, %v990_v48  ;;  %v430_v47 = vmul.f32 %v1006_v32, %v998_v0 }
  0x50   : > { %v1010_v49 = vpop.eup %1009  ;;  %v419_v50 = vmul.f32 %v1008_v42, %v1270_v16  ;;  %v423_v51 = vmul.f32 %v1008_v42, %v1288_v36  ;;  %v427_v53 = vmul.f32 %v1008_v42, %v992_v52  ;;  %v431_v54 = vmul.f32 %v1008_v42, %v1000_v4 }
  0x51   : > { %v420_v8 = vmul.f32 %v1010_v49, %v1276_v20  ;;  %v424_v24 = vmul.f32 %v1010_v49, %v1292_v40  ;;  %v428_v44 = vmul.f32 %v1010_v49, %v994_v56  ;;  %v432_v55 = vmul.f32 %v1010_v49, %v1002_v9 }
  0x52   : > { %v449_v12 = vsel %vm433_vm0, %v417_v37, 0.0  ;;  %v450_v28 = vsel %vm434_vm1, %v418_v43, 0.0  ;;  %v451_v48 = vsel %vm435_vm2, %v419_v50, 0.0  ;;  %v453_v16 = vsel %vm437_vm4, %v421_v38, 0.0 }
  0x53   : > { %v452_v36 = vsel %vm436_vm3, %v420_v8, 0.0  ;;  %v454_v20 = vsel %vm438_vm5, %v422_v45, 0.0  ;;  %v455_v40 = vsel %vm439_vm6, %v423_v51, 0.0  ;;  %v456_v52 = vsel %vm440_vm7, %v424_v24, 0.0 }
  0x54   : > { %v457_v56 = vsel %vm441_vm8, %v425_v39, 0.0  ;;  %v458_v57 = vsel %vm442_vm9, %v426_v46, 0.0  ;;  %v459_v58 = vsel %vm443_vm10, %v427_v53, 0.0  ;;  %v460_v59 = vsel %vm444_vm11, %v428_v44, 0.0 }
  0x55   : > { %v461_v60 = vsel %vm445_vm12, %v429_v41, 0.0  ;;  %v462_v61 = vsel %vm446_vm13, %v430_v47, 0.0  ;;  %vm1466_vm0 = vcmp.eq.s32.totalorder %v1222_v34, 3  ;;  %vm1467_vm1 = vcmp.eq.s32.totalorder %v1224_v35, 3 }
  0x56   : > { %v463_v62 = vsel %vm1466_vm0, %v431_v54, 0.0  ;;  %v464_v63 = vsel %vm1467_vm1, %v432_v55, 0.0  ;;  %v485_v0 = vadd.f32 %v450_v28, %v449_v12  ;;  %v488_v1 = vadd.f32 %v454_v20, %v453_v16 }
  0x57   : > { %v491_v2 = vadd.f32 %v458_v57, %v457_v56  ;;  %v494_v3 = vadd.f32 %v462_v61, %v461_v60  ;;  %v510_v4 = vadd.f32 %v418_v43, %v417_v37  ;;  %v513_v5 = vadd.f32 %v422_v45, %v421_v38 }
  0x58   : > { %v516_v6 = vadd.f32 %v426_v46, %v425_v39  ;;  %v519_v7 = vadd.f32 %v430_v47, %v429_v41  ;;  %v486_v9 = vadd.f32 %v485_v0, %v451_v48  ;;  %v489_v29 = vadd.f32 %v488_v1, %v455_v40 }
  0x59   : > { %v492_v10 = vadd.f32 %v491_v2, %v459_v58  ;;  %v495_v11 = vadd.f32 %v494_v3, %v463_v62  ;;  %v511_v33 = vadd.f32 %v510_v4, %v419_v50  ;;  %v514_v13 = vadd.f32 %v513_v5, %v423_v51 }
  0x5a   : > { %v517_v14 = vadd.f32 %v516_v6, %v427_v53  ;;  %v520_v34 = vadd.f32 %v519_v7, %v431_v54  ;;  %v487_v15 = vadd.f32 %v486_v9, %v452_v36  ;;  %v490_v17 = vadd.f32 %v489_v29, %v456_v52 }
  0x5b   : > { %v493_v35 = vadd.f32 %v492_v10, %v460_v59  ;;  %v496_v18 = vadd.f32 %v495_v11, %v464_v63  ;;  %v512_v19 = vadd.f32 %v511_v33, %v420_v8  ;;  %v515_v21 = vadd.f32 %v514_v13, %v424_v24 }
  0x5c   : > { %v518_v22 = vadd.f32 %v517_v14, %v428_v44  ;;  %v521_v23 = vadd.f32 %v520_v34, %v432_v55  ;;  %v570_v25 = vrot.slane %v487_v15, 4  ;;  %v576_v26 = vrot.slane %v490_v17, 4 }
  0x5d   : > { %v582_v27 = vrot.slane %v493_v35, 4  ;;  %v588_v32 = vrot.slane %v496_v18, 4  ;;  %v594_v37 = vrot.slane %v512_v19, 4  ;;  %v600_v38 = vrot.slane %v515_v21, 4 }
  0x5e   : > { %v606_v39 = vrot.slane %v518_v22, 4  ;;  %v612_v41 = vrot.slane %v521_v23, 4  ;;  %v571_v42 = vadd.f32 %v570_v25, %v487_v15  ;;  %v577_v43 = vadd.f32 %v576_v26, %v490_v17 }
  0x5f   : > { %v583_v45 = vadd.f32 %v582_v27, %v493_v35  ;;  %v589_v46 = vadd.f32 %v588_v32, %v496_v18  ;;  %vm658_vm2 = vcmask 1043459   ;;  %v595_v47 = vadd.f32 %v594_v37, %v512_v19 }
  0x60   : > { %v601_v49 = vadd.f32 %v600_v38, %v515_v21  ;;  %v607_v50 = vadd.f32 %v606_v39, %v518_v22  ;;  %v613_v51 = vadd.f32 %v612_v41, %v521_v23  ;;  %v572_v53 = vrot.slane %v571_v42, 2 }
  0x61   : > { %v578_v54 = vrot.slane %v577_v43, 2  ;;  %v584_v8 = vrot.slane %v583_v45, 2  ;;  %v590_v24 = vrot.slane %v589_v46, 2  ;;  %v596_v44 = vrot.slane %v595_v47, 2 }
  0x62   : > { %v602_v55 = vrot.slane %v601_v49, 2  ;;  %v608_v12 = vrot.slane %v607_v50, 2  ;;  %v614_v28 = vrot.slane %v613_v51, 2  ;;  %v573_v48 = vadd.f32 %v572_v53, %v571_v42 }
  0x63   : > { %v579_v16 = vadd.f32 %v578_v54, %v577_v43  ;;  %v585_v36 = vadd.f32 %v584_v8, %v583_v45  ;;  %v591_v20 = vadd.f32 %v590_v24, %v589_v46  ;;  %v597_v40 = vadd.f32 %v596_v44, %v595_v47 }
  0x64   : > { %v603_v52 = vadd.f32 %v602_v55, %v601_v49  ;;  %v609_v56 = vadd.f32 %v608_v12, %v607_v50  ;;  %v615_v57 = vadd.f32 %v614_v28, %v613_v51  ;;  %v574_v58 = vrot.slane %v573_v48, 1 }
  0x65   : > { %v580_v59 = vrot.slane %v579_v16, 1  ;;  %v586_v60 = vrot.slane %v585_v36, 1  ;;  %v592_v61 = vrot.slane %v591_v20, 1  ;;  %v598_v62 = vrot.slane %v597_v40, 1 }
  0x66   : > { %v604_v63 = vrot.slane %v603_v52, 1  ;;  %v610_v0 = vrot.slane %v609_v56, 1  ;;  %v616_v1 = vrot.slane %v615_v57, 1  ;;  %v575_v2 = vadd.f32 %v574_v58, %v573_v48 }
  0x67   : > { %v581_v3 = vadd.f32 %v580_v59, %v579_v16  ;;  %v587_v4 = vadd.f32 %v586_v60, %v585_v36  ;;  %v593_v5 = vadd.f32 %v592_v61, %v591_v20  ;;  %v599_v6 = vadd.f32 %v598_v62, %v597_v40 }
  0x68   : > { %v605_v7 = vadd.f32 %v604_v63, %v603_v52  ;;  %v611_v9 = vadd.f32 %v610_v0, %v609_v56  ;;  %v617_v29 = vadd.f32 %v616_v1, %v615_v57  ;;  %vm669_vm3 = vcmask 1043456  }
  0x69   : > { %v655_v10 = vsel %vm654_vm15, %v581_v3, %v575_v2  ;;  %v665_v14 = vsel %vm658_vm2, %v1299_v30, %v1302_v31  ;;  %v680_v19 = vlaneseq  ;;  %vm687_vm4 = vcmask 24576  }
  0x6a   : > { %v657_v11 = vsel %vm656_vm14, %v587_v4, %v655_v10  ;;  %v660_v33 = vsel %vm654_vm15, %v605_v7, %v599_v6  ;;  %v676_v18 = vsel %vm669_vm3, %v665_v14, 0.0 }
  0x6b   : > { %v659_v13 = vsel %vm658_vm2, %v593_v5, %v657_v11  ;;  %v661_v34 = vsel %vm656_vm14, %v611_v9, %v660_v33  ;;  %v681_v21 = vand.u32 127, %v680_v19  ;;  %v683_v22 = vshrl.u32 %v680_v19, 7 }
  0x6c   : > { %v670_v15 = vsel %vm669_vm3, %v659_v13, 0.0  ;;  %v662_v17 = vsel %vm658_vm2, %v617_v29, %v661_v34 }
  0x6d   : > { %671 = vadd.xlane.f32.xlu0 %v670_v15  ;;  %v673_v35 = vsel %vm669_vm3, %v662_v17, 0.0  ;;  %v684_v30 = vsub.s32 %v681_v21, %v683_v22 }
  0x6e   : > { %674 = vadd.xlane.f32.xlu1 %v673_v35 }
  0x71   : > { %677 = vadd.xlane.f32.xlu0 %v676_v18 }
  0xfa   : > { %v672_v31 = vpop.xlane.xlu0 %671 }
  0xfb   : > { %v685_v23 = vrot.slane %v672_v31, %v684_v30  ;;  %v675_v25 = vpop.xlane.xlu1 %674 }
  0xfc   : > { %v693_v26 = vrot.slane %v675_v25, %v684_v30 }
  0xfd   : > { %688 = vst.msk [vmem:[%s260_s14] sm:$0x1] %vm687_vm4, %v685_v23 }
  0xfe   : > { %v678_v27 = vpop.xlane.xlu0 %677  ;;  %695 = vst.msk [vmem:[%s303_s26] sm:$0x1] %vm687_vm4, %v693_v26 }
  0xff   : > { %1024 = shalt.err (!%p1021_p5)
}
 0x100   : > { %s1025_s14 = scalar_lea.hbm %s1367_s6, 16  ;;  %s1029_s30 = scalar_lea.hbm %s1459_s2, 32 }
 0x101   : > { %p1026_p6 = scmp.ne.s32.totalorder %s1367_s6, %s1025_s14  ;;  %p1030_p10 = scmp.lt.u32.totalorder %s1367_s6, %s1459_s2 }
 0x102   : > { %p1031_p11 = scmp.lt.u32.totalorder %s1029_s30, %s1025_s14  ;;  %p1033_p13 = scmp.lt.u32.totalorder %s1025_s14, %s1367_s6 }
 0x103   : > { %p1027_p7 = pnand %p1026_p6, %p1191_p4 }
 0x104   : > { %p1032_p12 = por %p1031_p11, %p1030_p10 }
 0x105   : > { %p1028_p9 = pneg %p1027_p7 }
 0x106   : > { %p1034_p0 = por %p1033_p13, %p1032_p12 }
 0x108   : > { %p1035_p1 = pnand %p1034_p0, %p1028_p9 }
 0x10a   : > { %1038 = shalt.err (!%p1035_p1)
}
 0x10b   : > { %910 = dma.vmem_to_hbm [thread:$0]  (%p1191_p4), %s1369_s21, 16, %s1367_s6, %s704_s29   ;;  %v700_v32 = vrot.slane %v678_v27, %v684_v30 }
 0x10c   : > { %s1405_s22 = scalar_lea.hbm %s1461_s4, %s905_s13  ;;  %s715_s14 = scalar_lea.sflag [#allocation6], %s1354_s12 }
 0x10d   : > { %702 = vst.msk [vmem:[%s275_s7] sm:$0x1] %vm687_vm4, %v700_v32  ;;  %s1039_s24 = scalar_lea.vmem %s1408_s8, 16  ;;  %s1125_s18 = smov [#allocation5]  }
 0x10e   : > { %p1040_p2 = scmp.ne.s32.totalorder %s1408_s8, %s1039_s24  ;;  %s1043_s21 = sshll.u32 %s1125_s18, 4  ;;  %s1044_s21 = int_to_ptr.vmem [resolvable:$false] %s1043_s21 }
 0x10f   : > { %s1045_s6 = scalar_lea.vmem %s1044_s21, 32  ;;  %p1046_p6 = scmp.lt.s32.totalorder %s1408_s8, %s1044_s21 }
 0x110   : > { %p1041_p3 = pnand %p1040_p2, %p1191_p4  ;;  %p1047_p7 = scmp.lt.s32.totalorder %s1045_s6, %s1039_s24 }
 0x112   : > { %p1042_p5 = pneg %p1041_p3  ;;  %p1048_p9 = por %p1047_p7, %p1046_p6 }
 0x114   : > { %p1049_p10 = pnand %p1048_p9, %p1042_p5 }
 0x116   : > { %1052 = shalt.err (!%p1049_p10)
}
 0x117   : > { %s1053_s12 = scalar_lea.hbm %s1405_s22, 16  ;;  %s1057_s29 = scalar_lea.hbm %s1461_s4, 32 }
 0x118   : > { %p1054_p11 = scmp.ne.s32.totalorder %s1405_s22, %s1053_s12  ;;  %p1058_p0 = scmp.lt.u32.totalorder %s1405_s22, %s1461_s4 }
 0x119   : > { %p1059_p1 = scmp.lt.u32.totalorder %s1057_s29, %s1053_s12  ;;  %p1061_p3 = scmp.lt.u32.totalorder %s1053_s12, %s1405_s22 }
 0x11a   : > { %p1055_p12 = pnand %p1054_p11, %p1191_p4 }
 0x11b   : > { %p1060_p2 = por %p1059_p1, %p1058_p0 }
 0x11c   : > { %p1056_p13 = pneg %p1055_p12 }
 0x11d   : > { %p1062_p5 = por %p1061_p3, %p1060_p2 }
 0x11f   : > { %p1063_p6 = pnand %p1062_p5, %p1056_p13 }
 0x121   : > { %1066 = shalt.err (!%p1063_p6)
}
 0x122   : > { %911 = dma.vmem_to_hbm [thread:$0]  (%p1191_p4), %s1408_s8, 16, %s1405_s22, %s715_s14  }
 0x123 PF: > { %p921_p7 = scmp.ge.s32.totalorder %s1121_s20, 2  ;;  %s759_s5 = sand.u32 1, %s1101_s15  }
 0x124   : > { %s760_s10 = scalar_lea.sflag [#allocation4], %s759_s5 }
 0x125   : > { %p915_p9 = pnand %p921_p7, %p1198_p8 }
 0x127   : > { %1092 = dma.done.wait (!%p915_p9), %s760_s10, 16  }
 0x128   : > { %1094 = vsyncadd (!%p915_p9), %s760_s10, 4294967280  ;;  %s778_s9 = scalar_lea.sflag [#allocation6], %s759_s5 }
 0x129   : > { %1096 = dma.done.wait (!%p915_p9), %s778_s9, 16  }
 0x12a   : > { %1098 = vsyncadd (!%p915_p9), %s778_s9, 4294967280  ;;  %s21_s20 = sadd.s32 1, %s1121_s20   ;;  %s1468_s15 = smov %s1105_s16 }
 0x12b   : > { %p18_p10 = scmp.ge.s32.totalorder %s21_s20, 4   ;;  %s1469_s16 = smov %s1109_s17 }
 0x12c   : > { %s1470_s17 = smov %s1204_s28  ;;  %s1471_s18 = smov %s1117_s19 }
 0x12d   : > { %s1472_s19 = smov %s1474_s23  ;;  %20 = sbr.rel (!%p18_p10) target bundleno = 6 (0x6), region = 105 }
 0x134   :  { %782 = vsyncpa [#allocation4], 1 }
 0x135   :  { %784 = vsyncpa [#allocation4 + $0x1], 1 }
 0x136   :  { %785 = vsyncpa [#allocation6], 1 }
 0x137   :  { %787 = vsyncpa [#allocation6 + $0x1], 1 }

</bundles_post_ra>
